<compile_context>
chip_gen: v5e
topology: v5e:2x2
jax: 0.10.0
libtpu: 0.0.40
codegen_flags: <defaults>
</compile_context>

<pallas_src>
import math

import jax
import jax.numpy as jnp
from jax.experimental import pallas as pl
from jax.experimental.pallas import tpu as pltpu


def _round_up(v, m):
    return (v + m - 1) // m * m


def _make_fused_gat_kernel(nclass, tile_n, fin_pad, fout_pad, cls_pad, use_l1):
    """Fused 2-layer GAT forward. Grid = (layer, row_tile)."""

    def kernel(x_ref, adj_ref, w_ref, a_ref, o_ref,
               h_sc, ssrc_sc, sdst_sc, prev_sc):
        l = pl.program_id(0)          # layer index (0 or 1)
        t = pl.program_id(1)          # row-tile index

        # ---------------- per-layer setup (once, at the first row tile) ----------------
        # h = feats @ W ; scores = h @ [a_src | a_dst]  (single fused matmul per layer)
        @pl.when(jnp.logical_and(l == 0, t == 0))
        def _():
            h = jnp.dot(x_ref[...], w_ref[0:fin_pad, :],
                        preferred_element_type=jnp.float32)
            h_sc[...] = h
            s = jnp.dot(h, a_ref[...], preferred_element_type=jnp.float32)  # (n_pad, 128)
            ssrc_sc[...] = s[:, 0:1]                                        # (n_pad, 1)
            sdst_sc[...] = s[:, 1:2].T                                      # (1, n_pad)

        @pl.when(jnp.logical_and(l == 1, t == 0))
        def _():
            h = jnp.dot(prev_sc[...], w_ref[0:fout_pad, :],
                        preferred_element_type=jnp.float32)
            h_sc[...] = h
            s = jnp.dot(h, a_ref[...], preferred_element_type=jnp.float32)
            ssrc_sc[...] = s[:, 0:1]
            sdst_sc[...] = s[:, 1:2].T

        # ---------------- per row-tile attention + aggregation ----------------
        row0 = pl.multiple_of(t * tile_n, tile_n)
        s_src = ssrc_sc[pl.ds(row0, tile_n), :]          # (TILE_N, 1)
        logits = s_src + sdst_sc[...]                    # (TILE_N, n_pad)
        # sigmoid(x) == 0.5 * (tanh(0.5 x) + 1): one EUP push instead of exp + recip.
        e = 0.5 * (jnp.tanh(0.5 * logits) + 1.0)
        att = e * adj_ref[...]                           # (TILE_N, n_pad)

        if use_l1:   # N == 2708 / 2709 branch of the reference -> L1 row norm
            norm = jnp.sum(jnp.abs(att), axis=1, keepdims=True) + 1e-10
        else:        # otherwise -> L2 row norm
            norm = jnp.sqrt(jnp.sum(att * att, axis=1, keepdims=True)) + 1e-10
        inv_norm = 1.0 / norm                            # (TILE_N, 1)

        # Scale after the matmul: (att / norm) @ h == (att @ h) * (1 / norm) per row.
        out_tile = jnp.dot(att, h_sc[...],
                           preferred_element_type=jnp.float32) * inv_norm   # (TILE_N, fout_pad)

        @pl.when(l == 0)
        def _():
            # Layer-1 output stays in VMEM as layer-2 input features.
            prev_sc[pl.ds(row0, tile_n), :] = out_tile

        @pl.when(l == 1)
        def _():
            # log_softmax over the (valid) class columns only.
            logit_cls = out_tile[:, 0:cls_pad]
            col = jax.lax.broadcasted_iota(jnp.int32, logit_cls.shape, 1)
            valid = col < nclass
            masked = jnp.where(valid, logit_cls, -jnp.inf)
            m = jnp.max(masked, axis=1, keepdims=True)
            lse = m + jnp.log(jnp.sum(jnp.exp(masked - m), axis=1, keepdims=True))
            o_ref[pl.ds(row0, tile_n), :] = jnp.where(valid, logit_cls - lse, 0.0)

    return kernel


def gat_forward(x, adj, params, *, tile_n_max=256):
    """GAT.forward: gat1 -> dropout(identity, eval) -> gat2 -> log_softmax(dim=1)."""
    N, nfeat = x.shape
    nhid = params["W1"].shape[1]
    nclass = params["W2"].shape[1]
    f32 = jnp.float32

    # Per-role lane-dense padding.
    fin_pad = _round_up(nfeat, 128)                  # input feature width
    hid_pad = _round_up(nhid, 128)
    cls_pad = _round_up(nclass, 128)                 # kernel output width
    fout_pad = max(hid_pad, cls_pad)                 # shared per-layer node-feature width
    w_rows = max(fin_pad, fout_pad)                  # shared row count for stacked W

    n_pad = _round_up(N, 8)
    if n_pad <= tile_n_max:
        tile_n = n_pad
    else:
        tile_n = tile_n_max
        n_pad = _round_up(N, tile_n)
    n_tiles = n_pad // tile_n

    # --- one-time padding / packing on the host side (hoisted out of the kernel) ---
    x_p = jnp.zeros((n_pad, fin_pad), f32).at[:N, :nfeat].set(x.astype(f32))
    adj_p = jnp.zeros((n_pad, n_pad), f32).at[:N, :N].set(adj.astype(f32))

    w_stack = jnp.zeros((2, w_rows, fout_pad), f32)
    w_stack = w_stack.at[0, :nfeat, :nhid].set(params["W1"].astype(f32))
    w_stack = w_stack.at[1, :nhid, :nclass].set(params["W2"].astype(f32))

    a1 = params["att1"].astype(f32)                  # (2*nhid, 1)
    a2 = params["att2"].astype(f32)                  # (2*nclass, 1)
    a_stack = jnp.zeros((2, fout_pad, 128), f32)     # cols 0/1 = [a_src | a_dst]
    a_stack = a_stack.at[0, :nhid, 0].set(a1[:nhid, 0])
    a_stack = a_stack.at[0, :nhid, 1].set(a1[nhid:, 0])
    a_stack = a_stack.at[1, :nclass, 0].set(a2[:nclass, 0])
    a_stack = a_stack.at[1, :nclass, 1].set(a2[nclass:, 0])

    use_l1 = N in (2708, 2709)

    out = pl.pallas_call(
        _make_fused_gat_kernel(nclass, tile_n, fin_pad, fout_pad, cls_pad, use_l1),
        out_shape=jax.ShapeDtypeStruct((n_pad, cls_pad), f32),
        grid=(2, n_tiles),
        in_specs=[
            pl.BlockSpec((n_pad, fin_pad), lambda l, t: (0, 0)),          # x (full, loaded once)
            pl.BlockSpec((tile_n, n_pad), lambda l, t: (t, 0)),           # adj row block
            pl.BlockSpec((None, w_rows, fout_pad), lambda l, t: (l, 0, 0)),  # W for this layer
            pl.BlockSpec((None, fout_pad, 128), lambda l, t: (l, 0, 0)),     # [a_src|a_dst] padded
        ],
        # Whole output stays resident in VMEM; single HBM writeback at grid end.
        out_specs=pl.BlockSpec((n_pad, cls_pad), lambda l, t: (0, 0)),
        scratch_shapes=[
            pltpu.VMEM((n_pad, fout_pad), f32),   # h (current layer's node features)
            pltpu.VMEM((n_pad, 1), f32),          # src scores
            pltpu.VMEM((1, n_pad), f32),          # dst scores (row layout)
            pltpu.VMEM((n_pad, fout_pad), f32),   # layer-1 output = layer-2 input
        ],
        compiler_params=pltpu.CompilerParams(
            dimension_semantics=("arbitrary", "arbitrary"),
            vmem_limit_bytes=64 * 1024 * 1024,
        ),
    )(x_p, adj_p, w_stack, a_stack)

    return out[:N, :nclass]


# ---------------- parameter init (deterministic, xavier_uniform gain=1.414) ----------------
def xavier_uniform(key, shape, gain=1.414):
    fan_in, fan_out = shape
    bound = gain * math.sqrt(6.0 / (fan_in + fan_out))
    return jax.random.uniform(key, shape, jnp.float32, minval=-bound, maxval=bound)


def init_gat_params(key, nfeat, nhid, nclass):
    k1, k2, k3, k4 = jax.random.split(key, 4)
    return {
        "W1": xavier_uniform(k1, (nfeat, nhid)),
        "att1": xavier_uniform(k2, (2 * nhid, 1)),
        "W2": xavier_uniform(k3, (nhid, nclass)),
        "att2": xavier_uniform(k4, (2 * nclass, 1)),
    }


# ---------------- pure-JAX reference (mirrors the torch code) ----------------
def _ref_layer(x, adj, W, a):
    h = x @ W
    fout = W.shape[1]
    e = jax.nn.sigmoid(h @ a[:fout] + (h @ a[fout:]).T)
    att = e * adj
    if adj.shape[0] in (2708, 2709):
        norm = jnp.sum(jnp.abs(att), axis=1, keepdims=True) + 1e-10
    else:
        norm = jnp.sqrt(jnp.sum(att * att, axis=1, keepdims=True)) + 1e-10
    att = att / norm
    return att @ h


def _ref_forward(x, adj, params):
    h = _ref_layer(x, adj, params["W1"], params["att1"])
    out = _ref_layer(h, adj, params["W2"], params["att2"])
    return out - jax.scipy.special.logsumexp(out, axis=1, keepdims=True)


if __name__ == "__main__":
    N, nfeat, nhid, nclass = 8, 16, 32, 8

    key = jax.random.PRNGKey(0)
    kx, kadj, kp = jax.random.split(key, 3)

    x = jax.random.normal(kx, (N, nfeat), dtype=jnp.float32)
    # dense symmetric adjacency with self-loops
    adj_rand = (jax.random.uniform(kadj, (N, N)) > 0.5).astype(jnp.float32)
    adj = jnp.clip(adj_rand + adj_rand.T + jnp.eye(N, dtype=jnp.float32), 0.0, 1.0)

    params = init_gat_params(kp, nfeat, nhid, nclass)

    out = gat_forward(x, adj, params)
    out = jax.block_until_ready(out)

    ref = _ref_forward(x, adj, params)
    assert out.shape == (N, nclass)
    assert jnp.allclose(out, ref, atol=1e-4, rtol=1e-4), "mismatch vs reference"

    print("KERNEL_OK")
</pallas_src>

<mosaic_0001>
module attributes {stable_mosaic.version = 11 : i64} {
  func.func @kernel(%arg0: i32, %arg1: i32, %arg2: memref<8x128xf32, #tpu.memory_space<vmem>>, %arg3: memref<8x8xf32, #tpu.memory_space<vmem>>, %arg4: memref<1x128x128xf32, #tpu.memory_space<vmem>>, %arg5: memref<1x128x128xf32, #tpu.memory_space<vmem>>, %arg6: memref<8x128xf32, #tpu.memory_space<vmem>>, %arg7: memref<8x128xf32, #tpu.memory_space<vmem>>, %arg8: memref<8x1xf32, #tpu.memory_space<vmem>>, %arg9: memref<1x8xf32, #tpu.memory_space<vmem>>, %arg10: memref<8x128xf32, #tpu.memory_space<vmem>>) attributes {dimension_semantics = [#tpu.dimension_semantics<arbitrary>, #tpu.dimension_semantics<arbitrary>], iteration_bounds = array<i64: 2, 1>, scalar_prefetch = 0 : i64, scratch_operands = 4 : i64, tpu.core_type = #tpu.core_type<tc>, window_params = [{pipeline_mode = #tpu.pipeline_mode<synchronous>, transform_indices = @transform_0, window_bounds = array<i64: 8, 128>}, {transform_indices = @transform_1, window_bounds = array<i64: 8, 8>}, {transform_indices = @transform_2, window_bounds = array<i64: 1, 128, 128>}, {transform_indices = @transform_3, window_bounds = array<i64: 1, 128, 128>}, {pipeline_mode = #tpu.pipeline_mode<synchronous>, transform_indices = @transform_4, window_bounds = array<i64: 8, 128>}]} {
    %c0_i32 = arith.constant 0 : i32
    %0 = arith.cmpi eq, %arg0, %c0_i32 : i32
    %c0_i32_0 = arith.constant 0 : i32
    %1 = arith.cmpi eq, %arg1, %c0_i32_0 : i32
    %2 = arith.andi %0, %1 : i1
    %3 = arith.extui %2 : i1 to i32
    %c0_i32_1 = arith.constant 0 : i32
    %4 = arith.cmpi ne, %3, %c0_i32_1 : i32
    scf.if %4 {
      %c0_20 = arith.constant 0 : index
      %c0_21 = arith.constant 0 : index
      %45 = vector.load %arg2[%c0_20, %c0_21] : memref<8x128xf32, #tpu.memory_space<vmem>>, vector<8x128xf32>
      %c0_22 = arith.constant 0 : index
      %c0_23 = arith.constant 0 : index
      %c0_24 = arith.constant 0 : index
      %46 = vector.load %arg4[%c0_22, %c0_23, %c0_24] : memref<1x128x128xf32, #tpu.memory_space<vmem>>, vector<1x128x128xf32>
      %47 = vector.shape_cast %46 : vector<1x128x128xf32> to vector<128x128xf32>
      %cst_25 = arith.constant dense<0.000000e+00> : vector<8x128xf32>
      %48 = tpu.matmul %45, %47, %cst_25 {dimension_numbers = #tpu.dot_dimension_numbers<[1], [0], [0], [1], [0, 0, 1, 1], [], []>} : vector<8x128xf32>, vector<128x128xf32>, vector<8x128xf32> -> vector<8x128xf32>
      %c0_26 = arith.constant 0 : index
      %c0_27 = arith.constant 0 : index
      %49 = vector.load %arg7[%c0_26, %c0_27] : memref<8x128xf32, #tpu.memory_space<vmem>>, vector<8x128xf32>
      tpu.vector_store %arg7[%c0_26, %c0_27], %48 {strides = array<i32>} : memref<8x128xf32, #tpu.memory_space<vmem>>, vector<8x128xf32>,
      %c0_28 = arith.constant 0 : index
      %c0_29 = arith.constant 0 : index
      %c0_30 = arith.constant 0 : index
      %50 = vector.load %arg5[%c0_28, %c0_29, %c0_30] : memref<1x128x128xf32, #tpu.memory_space<vmem>>, vector<1x128x128xf32>
      %51 = vector.shape_cast %50 : vector<1x128x128xf32> to vector<128x128xf32>
      %cst_31 = arith.constant dense<0.000000e+00> : vector<8x128xf32>
      %52 = tpu.matmul %48, %51, %cst_31 {dimension_numbers = #tpu.dot_dimension_numbers<[1], [0], [0], [1], [0, 0, 1, 1], [], []>} : vector<8x128xf32>, vector<128x128xf32>, vector<8x128xf32> -> vector<8x128xf32>
      %53 = vector.extract_strided_slice %52 {offsets = [0, 0], sizes = [8, 1], strides = [1, 1]} : vector<8x128xf32> to vector<8x1xf32>
      %c0_32 = arith.constant 0 : index
      %c0_33 = arith.constant 0 : index
      %54 = vector.load %arg8[%c0_32, %c0_33] : memref<8x1xf32, #tpu.memory_space<vmem>>, vector<8x1xf32>
      tpu.vector_store %arg8[%c0_32, %c0_33], %53 {strides = array<i32>} : memref<8x1xf32, #tpu.memory_space<vmem>>, vector<8x1xf32>,
      %55 = vector.extract_strided_slice %52 {offsets = [0, 1], sizes = [8, 1], strides = [1, 1]} : vector<8x128xf32> to vector<8x1xf32>
      %56 = tpu.transpose %55, [1, 0] : vector<8x1xf32> -> vector<1x8xf32>
      %c0_34 = arith.constant 0 : index
      %c0_35 = arith.constant 0 : index
      %57 = vector.load %arg9[%c0_34, %c0_35] : memref<1x8xf32, #tpu.memory_space<vmem>>, vector<1x8xf32>
      tpu.vector_store %arg9[%c0_34, %c0_35], %56 {strides = array<i32>} : memref<1x8xf32, #tpu.memory_space<vmem>>, vector<1x8xf32>,
    } else {
    }
    %c1_i32 = arith.constant 1 : i32
    %5 = arith.cmpi eq, %arg0, %c1_i32 : i32
    %c0_i32_2 = arith.constant 0 : i32
    %6 = arith.cmpi eq, %arg1, %c0_i32_2 : i32
    %7 = arith.andi %5, %6 : i1
    %8 = arith.extui %7 : i1 to i32
    %c0_i32_3 = arith.constant 0 : i32
    %9 = arith.cmpi ne, %8, %c0_i32_3 : i32
    scf.if %9 {
      %c0_20 = arith.constant 0 : index
      %c0_21 = arith.constant 0 : index
      %45 = vector.load %arg10[%c0_20, %c0_21] : memref<8x128xf32, #tpu.memory_space<vmem>>, vector<8x128xf32>
      %c0_22 = arith.constant 0 : index
      %c0_23 = arith.constant 0 : index
      %c0_24 = arith.constant 0 : index
      %46 = vector.load %arg4[%c0_22, %c0_23, %c0_24] : memref<1x128x128xf32, #tpu.memory_space<vmem>>, vector<1x128x128xf32>
      %47 = vector.shape_cast %46 : vector<1x128x128xf32> to vector<128x128xf32>
      %cst_25 = arith.constant dense<0.000000e+00> : vector<8x128xf32>
      %48 = tpu.matmul %45, %47, %cst_25 {dimension_numbers = #tpu.dot_dimension_numbers<[1], [0], [0], [1], [0, 0, 1, 1], [], []>} : vector<8x128xf32>, vector<128x128xf32>, vector<8x128xf32> -> vector<8x128xf32>
      %c0_26 = arith.constant 0 : index
      %c0_27 = arith.constant 0 : index
      %49 = vector.load %arg7[%c0_26, %c0_27] : memref<8x128xf32, #tpu.memory_space<vmem>>, vector<8x128xf32>
      tpu.vector_store %arg7[%c0_26, %c0_27], %48 {strides = array<i32>} : memref<8x128xf32, #tpu.memory_space<vmem>>, vector<8x128xf32>,
      %c0_28 = arith.constant 0 : index
      %c0_29 = arith.constant 0 : index
      %c0_30 = arith.constant 0 : index
      %50 = vector.load %arg5[%c0_28, %c0_29, %c0_30] : memref<1x128x128xf32, #tpu.memory_space<vmem>>, vector<1x128x128xf32>
      %51 = vector.shape_cast %50 : vector<1x128x128xf32> to vector<128x128xf32>
      %cst_31 = arith.constant dense<0.000000e+00> : vector<8x128xf32>
      %52 = tpu.matmul %48, %51, %cst_31 {dimension_numbers = #tpu.dot_dimension_numbers<[1], [0], [0], [1], [0, 0, 1, 1], [], []>} : vector<8x128xf32>, vector<128x128xf32>, vector<8x128xf32> -> vector<8x128xf32>
      %53 = vector.extract_strided_slice %52 {offsets = [0, 0], sizes = [8, 1], strides = [1, 1]} : vector<8x128xf32> to vector<8x1xf32>
      %c0_32 = arith.constant 0 : index
      %c0_33 = arith.constant 0 : index
      %54 = vector.load %arg8[%c0_32, %c0_33] : memref<8x1xf32, #tpu.memory_space<vmem>>, vector<8x1xf32>
      tpu.vector_store %arg8[%c0_32, %c0_33], %53 {strides = array<i32>} : memref<8x1xf32, #tpu.memory_space<vmem>>, vector<8x1xf32>,
      %55 = vector.extract_strided_slice %52 {offsets = [0, 1], sizes = [8, 1], strides = [1, 1]} : vector<8x128xf32> to vector<8x1xf32>
      %56 = tpu.transpose %55, [1, 0] : vector<8x1xf32> -> vector<1x8xf32>
      %c0_34 = arith.constant 0 : index
      %c0_35 = arith.constant 0 : index
      %57 = vector.load %arg9[%c0_34, %c0_35] : memref<1x8xf32, #tpu.memory_space<vmem>>, vector<1x8xf32>
      tpu.vector_store %arg9[%c0_34, %c0_35], %56 {strides = array<i32>} : memref<1x8xf32, #tpu.memory_space<vmem>>, vector<1x8xf32>,
    } else {
    }
    %c8_i32 = arith.constant 8 : i32
    %10 = arith.muli %arg1, %c8_i32 : i32
    %11 = tpu.assume_multiple %10, 8 : i32
    %12 = arith.index_cast %11 : i32 to index
    %c0 = arith.constant 0 : index
    %13 = vector.load %arg8[%12, %c0] : memref<8x1xf32, #tpu.memory_space<vmem>>, vector<8x1xf32>
    %c0_4 = arith.constant 0 : index
    %c0_5 = arith.constant 0 : index
    %14 = vector.load %arg9[%c0_4, %c0_5] : memref<1x8xf32, #tpu.memory_space<vmem>>, vector<1x8xf32>
    %15 = vector.broadcast %13 : vector<8x1xf32> to vector<8x8xf32>
    %16 = vector.broadcast %14 : vector<1x8xf32> to vector<8x8xf32>
    %17 = arith.addf %15, %16 : vector<8x8xf32>
    %cst = arith.constant 5.000000e-01 : f32
    %18 = vector.broadcast %cst : f32 to vector<8x8xf32>
    %19 = arith.mulf %18, %17 : vector<8x8xf32>
    %20 = math.tanh %19 : vector<8x8xf32>
    %cst_6 = arith.constant 1.000000e+00 : f32
    %21 = vector.broadcast %cst_6 : f32 to vector<8x8xf32>
    %22 = arith.addf %20, %21 : vector<8x8xf32>
    %cst_7 = arith.constant 5.000000e-01 : f32
    %23 = vector.broadcast %cst_7 : f32 to vector<8x8xf32>
    %24 = arith.mulf %23, %22 : vector<8x8xf32>
    %c0_8 = arith.constant 0 : index
    %c0_9 = arith.constant 0 : index
    %25 = vector.load %arg3[%c0_8, %c0_9] : memref<8x8xf32, #tpu.memory_space<vmem>>, vector<8x8xf32>
    %26 = arith.mulf %24, %25 : vector<8x8xf32>
    %27 = arith.mulf %26, %26 : vector<8x8xf32>
    %cst_10 = arith.constant dense<0.000000e+00> : vector<8xf32>
    %28 = vector.multi_reduction <add>, %27, %cst_10 [1] : vector<8x8xf32> to vector<8xf32>
    %29 = vector.shape_cast %28 : vector<8xf32> to vector<8x1xf32>
    %30 = math.sqrt %29 : vector<8x1xf32>
    %cst_11 = arith.constant 1.000000e-10 : f32
    %31 = vector.broadcast %cst_11 : f32 to vector<8x1xf32>
    %32 = arith.addf %30, %31 : vector<8x1xf32>
    %cst_12 = arith.constant 1.000000e+00 : f32
    %33 = vector.broadcast %cst_12 : f32 to vector<8x1xf32>
    %34 = arith.divf %33, %32 : vector<8x1xf32>
    %c0_13 = arith.constant 0 : index
    %c0_14 = arith.constant 0 : index
    %35 = vector.load %arg7[%c0_13, %c0_14] : memref<8x128xf32, #tpu.memory_space<vmem>>, vector<8x128xf32>
    %cst_15 = arith.constant dense<0.000000e+00> : vector<8x128xf32>
    %36 = tpu.matmul %26, %35, %cst_15 {dimension_numbers = #tpu.dot_dimension_numbers<[1], [0], [0], [1], [0, 0, 1, 1], [], []>} : vector<8x8xf32>, vector<8x128xf32>, vector<8x128xf32> -> vector<8x128xf32>
    %37 = vector.broadcast %34 : vector<8x1xf32> to vector<8x128xf32>
    %38 = arith.mulf %36, %37 : vector<8x128xf32>
    %c0_i32_16 = arith.constant 0 : i32
    %39 = arith.cmpi eq, %arg0, %c0_i32_16 : i32
    %40 = arith.extui %39 : i1 to i32
    %c0_i32_17 = arith.constant 0 : i32
    %41 = arith.cmpi ne, %40, %c0_i32_17 : i32
    scf.if %41 {
      %45 = arith.index_cast %11 : i32 to index
      %c0_20 = arith.constant 0 : index
      %46 = vector.load %arg10[%45, %c0_20] : memref<8x128xf32, #tpu.memory_space<vmem>>, vector<8x128xf32>
      tpu.vector_store %arg10[%45, %c0_20], %38 {strides = array<i32>} : memref<8x128xf32, #tpu.memory_space<vmem>>, vector<8x128xf32>,
    } else {
    }
    %c1_i32_18 = arith.constant 1 : i32
    %42 = arith.cmpi eq, %arg0, %c1_i32_18 : i32
    %43 = arith.extui %42 : i1 to i32
    %c0_i32_19 = arith.constant 0 : i32
    %44 = arith.cmpi ne, %43, %c0_i32_19 : i32
    scf.if %44 {
      %45 = tpu.iota {dimensions = array<i32: 1>} : vector<8x128xi32>
      %c8_i32_20 = arith.constant 8 : i32
      %46 = vector.broadcast %c8_i32_20 : i32 to vector<8x128xi32>
      %47 = arith.cmpi slt, %45, %46 : vector<8x128xi32>
      %cst_21 = arith.constant 0xFF800000 : f32
      %48 = vector.broadcast %cst_21 : f32 to vector<8x128xf32>
      %49 = arith.select %47, %38, %48 : vector<8x128xi1>, vector<8x128xf32>
      %cst_22 = arith.constant dense<0xFF800000> : vector<8xf32>
      %50 = vector.multi_reduction <maximumf>, %49, %cst_22 [1] : vector<8x128xf32> to vector<8xf32>
      %51 = vector.shape_cast %50 : vector<8xf32> to vector<8x1xf32>
      %52 = vector.broadcast %51 : vector<8x1xf32> to vector<8x128xf32>
      %53 = arith.subf %49, %52 : vector<8x128xf32>
      %54 = math.exp %53 : vector<8x128xf32>
      %cst_23 = arith.constant dense<0.000000e+00> : vector<8xf32>
      %55 = vector.multi_reduction <add>, %54, %cst_23 [1] : vector<8x128xf32> to vector<8xf32>
      %56 = vector.shape_cast %55 : vector<8xf32> to vector<8x1xf32>
      %57 = math.log %56 : vector<8x1xf32>
      %58 = arith.addf %51, %57 : vector<8x1xf32>
      %59 = vector.broadcast %58 : vector<8x1xf32> to vector<8x128xf32>
      %60 = arith.subf %38, %59 : vector<8x128xf32>
      %cst_24 = arith.constant 0.000000e+00 : f32
      %61 = vector.broadcast %cst_24 : f32 to vector<8x128xf32>
      %62 = arith.select %47, %60, %61 : vector<8x128xi1>, vector<8x128xf32>
      %63 = arith.index_cast %11 : i32 to index
      %c0_25 = arith.constant 0 : index
      %64 = vector.load %arg6[%63, %c0_25] : memref<8x128xf32, #tpu.memory_space<vmem>>, vector<8x128xf32>
      tpu.vector_store %arg6[%63, %c0_25], %62 {strides = array<i32>} : memref<8x128xf32, #tpu.memory_space<vmem>>, vector<8x128xf32>,
    } else {
    }
    return
  }
  func.func @transform_0(%arg0: i32, %arg1: i32) -> (i32, i32) {
    %c0_i32 = arith.constant 0 : i32
    %c0_i32_0 = arith.constant 0 : i32
    %c0_i32_1 = arith.constant 0 : i32
    return %c0_i32, %c0_i32_0 : i32, i32
  }
  func.func @transform_1(%arg0: i32, %arg1: i32) -> (i32, i32) {
    %c0_i32 = arith.constant 0 : i32
    %c0_i32_0 = arith.constant 0 : i32
    return %arg1, %c0_i32 : i32, i32
  }
  func.func @transform_2(%arg0: i32, %arg1: i32) -> (i32, i32, i32) {
    %c0_i32 = arith.constant 0 : i32
    %c0_i32_0 = arith.constant 0 : i32
    %c0_i32_1 = arith.constant 0 : i32
    return %arg0, %c0_i32, %c0_i32_0 : i32, i32, i32
  }
  func.func @transform_3(%arg0: i32, %arg1: i32) -> (i32, i32, i32) {
    %c0_i32 = arith.constant 0 : i32
    %c0_i32_0 = arith.constant 0 : i32
    %c0_i32_1 = arith.constant 0 : i32
    return %arg0, %c0_i32, %c0_i32_0 : i32, i32, i32
  }
  func.func @transform_4(%arg0: i32, %arg1: i32) -> (i32, i32) {
    %c0_i32 = arith.constant 0 : i32
    %c0_i32_0 = arith.constant 0 : i32
    %c0_i32_1 = arith.constant 0 : i32
    return %c0_i32, %c0_i32_0 : i32, i32
  }
}

</mosaic_0001>

<bundles_post_ra>
// kernel: tpu_custom_call.1
= control target key start
LH: loop header
LB: loop body
LE: loop exit
PB: predicated region body
PF: predicated region fallthrough
CT: control target
= control target key end

     0   :  { %s1340_s0 = inlined_call_operand.hbm [shape: f32[8,128], index: 0, kind: input, shape index: {}]   ;;  %s1341_s1 = inlined_call_operand.hbm [shape: f32[8,8], index: 1, kind: input, shape index: {}]   ;;  %s1342_s2 = inlined_call_operand.hbm [shape: f32[2,128,128], index: 2, kind: input, shape index: {}]   ;;  %s1343_s3 = inlined_call_operand.hbm [shape: f32[2,128,128], index: 3, kind: input, shape index: {}]   ;;  %s1344_s4 = inlined_call_operand.hbm [shape: f32[8,128], index: 4, kind: output, shape index: {}]  }
   0x1   :  { %1347 = sst [smem:[#allocation20_spill]] %s1340_s0 }
   0x2   :  { %1348 = sst [smem:[#allocation21_spill]] %s1342_s2 }
   0x3   :  { %9 = vsyncpa [#allocation7], 0 }
   0x4   :  { %10 = vsyncpa [#allocation10], 0 }
   0x5   :  { %11 = vsyncpa [#allocation8], 0  ;;  %s1129_s15 = smov 0   ;;  %s1131_s16 = smov 0  }
   0x6   :  { %s1133_s17 = smov 0   ;;  %s1135_s18 = smov 0  }
   0x7   :  { %s1137_s19 = smov 0   ;;  %s1139_s20 = smov 0  }
   0x8 LB: > { %1349 = sst [smem:[#allocation18_spill]] %s1090_s19  ;;  %s1158_s21 = sadd.s32 4294967295, %s1094_s20   ;;  %s1094_s20 = sphi %s1139_s20, %s17_s20   ;;  %s1090_s19 = sphi %s1137_s19, %s1359_s19   ;;  %s1086_s18 = sphi %s1135_s18, %s1358_s18   ;;  %s1082_s17 = sphi %s1133_s17, %s1362_s17   ;;  %s1078_s16 = sphi %s1131_s16, %s1361_s16   ;;  %s1074_s15 = sphi %s1129_s15, %s1360_s15  }
   0x9   : > { %s83_s22 = sadd.s32 1, %s1082_s17  ;;  %p90_p0 = scmp.ne.s32.totalorder %s1082_s17, %s1078_s16 }
   0xa   : > { %p91_p1 = scmp.eq.s32.totalorder %s1094_s20, 0  ;;  %p96_p2 = scmp.ne.s32.totalorder %s1078_s16, %s1074_s15 }
   0xb   : > { %p97_p3 = scmp.eq.s32.totalorder %s1158_s21, 0  ;;  %p749_p5 = scmp.ge.s32.totalorder %s1094_s20, 1 }
   0xc   : > { %p1166_p4 = por %p91_p1, %p90_p0  ;;  %p154_p7 = scmp.lt.s32.totalorder %s1094_s20, 3 }
   0xd   : > { %p1173_p6 = por %p97_p3, %p96_p2  ;;  %s1352_s0 = sld [smem:[#allocation20_spill]] }
   0xe   : > { %p1181_p8 = pnand %p749_p5, %p154_p7  ;;  %s1096_s29 = smov [#allocation6]  }
   0xf   : > { %s168_s30 = sshll.u32 %s1096_s29, 4  ;;  %p809_p10 = scmp.lt.s32.totalorder %s1094_s20, 2  ;;  %s169_s30 = int_to_ptr.vmem [resolvable:$true] %s168_s30 }
  0x10   : > { %p793_p9 = pneg %p1181_p8  ;;  %s29_s7 = sadd.s32 1, %s1090_s19 }
  0x11   : > { %p1196_p12 = pnand %p809_p10, %p1166_p4  ;;  %p31_p13 = scmp.ge.s32.totalorder %s29_s7, 2 }
  0x12   : > { %p1190_p11 = pnand %p793_p9, %p97_p3  ;;  %s193_s8 = sand.u32 1, %s1094_s20  }
  0x13   : > { %s166_s27 = sshll.u32 %s1352_s0, 4  ;;  %s195_s9 = sand.u32 1, %s1082_s17   ;;  %s167_s27 = int_to_ptr.hbm [resolvable:$true] %s166_s27 }
  0x14   : > { %796 = dma.hbm_to_vmem [thread:$0]  (!%p1190_p11), %s167_s27, 128, %s169_s30, [#allocation7]  }
  0x15   : > { %s1364_s7 = smov (%p31_p13, %s29_s7), 0  ;;  %s753_s10 = sshll.u32 %s195_s9, 7 }
  0x16   : > { %1356 = sst [smem:[#allocation19_spill]] %s1364_s7  ;;  %s80_s11 = ssub.s32 %s1090_s19, %s1364_s7 }
  0x17   : > { %p81_p0 = scmp.eq.s32.totalorder %s80_s11, 0  ;;  %s773_s12 = sshll.u32 %s1090_s19, 7 }
  0x18   : > { %s1357_s2 = sld [smem:[#allocation21_spill]]  ;;  %s197_s23 = scalar_lea.vmem [#allocation11], %s753_s10 }
  0x19   : > { %s205_s25 = sshll.u32 %s197_s23, 4  ;;  %s180_s9 = sshll.u32 %s1341_s1, 4  ;;  %s206_s25 = int_to_ptr.vmem [resolvable:$true] %s205_s25  ;;  %s181_s9 = int_to_ptr.hbm [resolvable:$true] %s180_s9 }
  0x1a   : > { %s1216_s26 = scalar_select %p81_p0, %s1082_s17, %s83_s22  }
  0x1b   : > { %s194_s11 = scalar_lea.sflag [#allocation7], %s193_s8  ;;  %s1097_s0 = smov 128  }
  0x1c   : > { %s1098_s7 = smov 8   ;;  %s1099_s13 = smov [#allocation9]  }
  0x1d   : > { %s182_s14 = sshll.u32 %s1099_s13, 4  ;;  %s219_s19 = scalar_lea.vmem [#allocation12], %s753_s10  ;;  %s183_s14 = int_to_ptr.vmem [resolvable:$true] %s182_s14 }
  0x1e   : > { %s202_s15 = scalar_lea.hbm %s1357_s2, %s773_s12  ;;  %s227_s29 = sshll.u32 %s219_s19, 4  ;;  %s228_s29 = int_to_ptr.vmem [resolvable:$true] %s227_s29 }
  0x1f   : > { %s203_s27 = sshll.u32 %s202_s15, 4  ;;  %s224_s15 = scalar_lea.hbm %s1343_s3, %s773_s12  ;;  %s204_s27 = int_to_ptr.hbm [resolvable:$true] %s203_s27 }
  0x20   : > { %803 = dma.hbm_to_vmem [thread:$0]  (!%p1196_p12), %s204_s27, 2048, %s206_s25, %s194_s11, %s1097_s0, %s1097_s0, %s1098_s7  }
  0x21   : > { %799 = dma.hbm_to_vmem [thread:$0]  (!%p1190_p11), %s181_s9, 128, %s183_s14, [#allocation10]  }
  0x22   : > { %s225_s2 = sshll.u32 %s224_s15, 4  ;;  %239 = sbr.rel (%p1181_p8) target bundleno = 1751 (0x6d7), region = 36  ;;  %s226_s2 = int_to_ptr.hbm [resolvable:$true] %s225_s2 }
  0x23   : > { %806 = dma.hbm_to_vmem [thread:$0]  (!%p1196_p12), %s226_s2, 2048, %s228_s29, %s194_s11, %s1097_s0, %s1097_s0, %s1098_s7  }
  0x27   : > { %1057 = dma.done.wait (%p97_p3), [#allocation7], 128  }
  0x28   : > { %1059 = vsyncadd (%p97_p3), [#allocation7], 4294967168 }
  0x29   : > { %1061 = dma.done.wait (%p97_p3), [#allocation10], 128  }
  0x2a   : > { %1063 = vsyncadd (%p97_p3), [#allocation10], 4294967168  ;;  %s251_s19 = sand.u32 1, %s1158_s21   ;;  %s253_s0 = sand.u32 1, %s1078_s16  }
  0x2b   : > { %s762_s2 = sshll.u32 %s253_s0, 7  ;;  %s252_s28 = scalar_lea.sflag [#allocation7], %s251_s19 }
  0x2c   : > { %s1242_s5 = scalar_lea.vmem [#allocation11], %s762_s2 }
  0x2d   : > { %1065 = dma.done.wait (%p1173_p6), %s252_s28, 4096  }
  0x2e   : > { %1067 = vsyncadd (%p1173_p6), %s252_s28, 4294963200  ;;  %p291_p1 = scmp.eq.s32.totalorder %s1086_s18, 0  ;;  %s1249_s6 = scalar_lea.vmem [#allocation12], %s762_s2 }
  0x2f   : > { %v313_v0 = vld [vmem:[%s1242_s5 + $0x78] sm:$0xff] (%p291_p1)  ;;  %v312_v1 = vld [vmem:[%s1242_s5 + $0x70] sm:$0xff] (%p291_p1)  ;;  %v311_v2 = vld [vmem:[%s1242_s5 + $0x68] sm:$0xff] (%p291_p1)  ;;  %vm371_vm0 = vcmask (%p291_p1), 7168   ;;  %s1100_s24 = smov (%p291_p1), 127   ;;  %vm409_vm1 = vcmask (%p291_p1), 57344  }
  0x30   : > { %296 = sbr.rel (!%p291_p1) target bundleno = 612 (0x264), region = 56  ;;  %314 = vmatpush.msra.mxu0 (%p291_p1), %v313_v0  ;;  %v310_v3 = vld [vmem:[%s1242_s5 + $0x60] sm:$0xff] (%p291_p1)  ;;  %v350_v4 = vld [vmem:[%s1249_s6 + $0x78] sm:$0xff] (%p291_p1)  ;;  %v349_v6 = vld [vmem:[%s1249_s6 + $0x70] sm:$0xff] (%p291_p1) }
  0x31   : > { %v309_v5 = vld [vmem:[%s1242_s5 + $0x58] sm:$0xff] (%p291_p1)  ;;  %351 = vmatpush.msra.mxu1 (%p291_p1), %v350_v4  ;;  %v348_v7 = vld [vmem:[%s1249_s6 + $0x68] sm:$0xff] (%p291_p1)  ;;  %v308_v8 = vld [vmem:[%s1242_s5 + $0x50] sm:$0xff] (%p291_p1) }
  0x32   : > { %315 = vmatpush.msra.mxu0 (%p291_p1), %v312_v1  ;;  %v347_v9 = vld [vmem:[%s1249_s6 + $0x60] sm:$0xff] (%p291_p1)  ;;  %v307_v10 = vld [vmem:[%s1242_s5 + $0x48] sm:$0xff] (%p291_p1)  ;;  %v346_v11 = vld [vmem:[%s1249_s6 + $0x58] sm:$0xff] (%p291_p1) }
  0x33   : > { %352 = vmatpush.msra.mxu1 (%p291_p1), %v349_v6  ;;  %v306_v12 = vld [vmem:[%s1242_s5 + $0x40] sm:$0xff] (%p291_p1)  ;;  %v345_v13 = vld [vmem:[%s1249_s6 + $0x50] sm:$0xff] (%p291_p1)  ;;  %v305_v14 = vld [vmem:[%s1242_s5 + $0x38] sm:$0xff] (%p291_p1) }
  0x34   : > { %316 = vmatpush.msra.mxu0 (%p291_p1), %v311_v2  ;;  %v344_v15 = vld [vmem:[%s1249_s6 + $0x48] sm:$0xff] (%p291_p1)  ;;  %v304_v16 = vld [vmem:[%s1242_s5 + $0x30] sm:$0xff] (%p291_p1)  ;;  %v343_v17 = vld [vmem:[%s1249_s6 + $0x40] sm:$0xff] (%p291_p1) }
  0x35   : > { %353 = vmatpush.msra.mxu1 %v348_v7  ;;  %v303_v18 = vld [vmem:[%s1242_s5 + $0x28] sm:$0xff]  ;;  %v342_v19 = vld [vmem:[%s1249_s6 + $0x38] sm:$0xff]  ;;  %v302_v20 = vld [vmem:[%s1242_s5 + $0x20] sm:$0xff] }
  0x36   : > { %317 = vmatpush.msra.mxu0 %v310_v3  ;;  %v341_v21 = vld [vmem:[%s1249_s6 + $0x30] sm:$0xff]  ;;  %v301_v22 = vld [vmem:[%s1242_s5 + $0x18] sm:$0xff]  ;;  %v340_v23 = vld [vmem:[%s1249_s6 + $0x28] sm:$0xff] }
  0x37   : > { %354 = vmatpush.msra.mxu1 %v347_v9  ;;  %v300_v24 = vld [vmem:[%s1242_s5 + $0x10] sm:$0xff]  ;;  %v339_v25 = vld [vmem:[%s1249_s6 + $0x20] sm:$0xff]  ;;  %v299_v26 = vld [vmem:[%s1242_s5 + $0x8] sm:$0xff] }
  0x38   : > { %318 = vmatpush.msra.mxu0 %v309_v5  ;;  %v338_v27 = vld [vmem:[%s1249_s6 + $0x18] sm:$0xff]  ;;  %v298_v28 = vld [vmem:[%s1242_s5] sm:$0xff]  ;;  %v297_v29 = vld [vmem:[#allocation6] sm:$0xff] }
  0x39   : > { %355 = vmatpush.msra.mxu1 %v346_v11  ;;  %v337_v30 = vld [vmem:[%s1249_s6 + $0x10] sm:$0xff]  ;;  %v336_v31 = vld [vmem:[%s1249_s6 + $0x8] sm:$0xff]  ;;  %v335_v32 = vld [vmem:[%s1249_s6] sm:$0xff] }
  0x3a   : > { %319 = vmatpush.msra.mxu0 %v308_v8 }
  0x3b   : > { %356 = vmatpush.msra.mxu1 %v345_v13 }
  0x3c   : > { %320 = vmatpush.msra.mxu0 %v307_v10 }
  0x3d   : > { %357 = vmatpush.msra.mxu1 %v344_v15 }
  0x3e   : > { %321 = vmatpush.msra.mxu0 %v306_v12 }
  0x3f   : > { %358 = vmatpush.msra.mxu1 %v343_v17 }
  0x40   : > { %322 = vmatpush.msra.mxu0 %v305_v14 }
  0x41   : > { %359 = vmatpush.msra.mxu1 %v342_v19 }
  0x42   : > { %323 = vmatpush.msra.mxu0 %v304_v16 }
  0x43   : > { %360 = vmatpush.msra.mxu1 %v341_v21 }
  0x44   : > { %324 = vmatpush.msra.mxu0 %v303_v18 }
  0x45   : > { %361 = vmatpush.msra.mxu1 %v340_v23 }
  0x46   : > { %325 = vmatpush.msra.mxu0 %v302_v20 }
  0x47   : > { %362 = vmatpush.msra.mxu1 %v339_v25 }
  0x48   : > { %326 = vmatpush.msra.mxu0 %v301_v22 }
  0x49   : > { %363 = vmatpush.msra.mxu1 %v338_v27 }
  0x4a   : > { %327 = vmatpush.msra.mxu0 %v300_v24 }
  0x4b   : > { %364 = vmatpush.msra.mxu1 %v337_v30 }
  0x4c   : > { %328 = vmatpush.msra.mxu0 %v299_v26 }
  0x4d   : > { %365 = vmatpush.msra.mxu1 %v336_v31 }
  0x4e   : > { %329 = vmatpush.msra.mxu0 %v298_v28 }
  0x4f   : > { %330 = vmatmul.f32.vlgmr.msra.gmra.mxu0 %v297_v29  ;;  %366 = vmatpush.msra.mxu1 %v335_v32 }
  0xcc   : > { %v331_v33 = vpop.f32.mrf.mxu0 }
  0xcd   : > { %334 = vst [vmem:[#allocation2] sm:$0xff] %v331_v33  ;;  %367 = vmatmul.f32.vlgmr.msra.gmra.mxu1 %v331_v33 }
 0x14a   : > { %v368_v34 = vpop.f32.mrf.mxu1 }
 0x14b   : > { %372 = vst.msk [vmem:[#allocation3] sm:$0xff] %vm371_vm0, %v368_v34  ;;  %374 = vrot.lane.b32.xlu0 %v368_v34, %s1100_s24 }
 0x1bd   : > { %v375_v35 = vpop.permute.xlu0 %374 }
 0x1be   : > { %377 = vxpose.xlu0.b32.start.end [1/1] (short) (narrow) %v375_v35, 8 }
 0x262   : > { %v393_v36 = vpop.trf.xlu0 }
 0x263   : > { %410 = vst.msk [vmem:[#allocation4] sm:$0x1] %vm409_vm1, %v393_v36 }
 0x264 PF: > { %p411_p2 = scmp.eq.s32.totalorder %s1086_s18, 1 }
 0x265   : > { %v432_v37 = vld [vmem:[%s1242_s5 + $0x78] sm:$0xff] (%p411_p2)  ;;  %v431_v38 = vld [vmem:[%s1242_s5 + $0x70] sm:$0xff] (%p411_p2)  ;;  %v430_v39 = vld [vmem:[%s1242_s5 + $0x68] sm:$0xff] (%p411_p2)  ;;  %vm490_vm2 = vcmask (%p411_p2), 7168   ;;  %s1101_s7 = smov (%p411_p2), 127   ;;  %vm528_vm3 = vcmask (%p411_p2), 57344  }
 0x266   : > { %415 = sbr.rel (!%p411_p2) target bundleno = 1178 (0x49a), region = 60  ;;  %433 = vmatpush.msra.mxu0 (%p411_p2), %v432_v37  ;;  %v429_v40 = vld [vmem:[%s1242_s5 + $0x60] sm:$0xff] (%p411_p2)  ;;  %v469_v41 = vld [vmem:[%s1249_s6 + $0x78] sm:$0xff] (%p411_p2)  ;;  %v468_v43 = vld [vmem:[%s1249_s6 + $0x70] sm:$0xff] (%p411_p2) }
 0x267   : > { %v428_v42 = vld [vmem:[%s1242_s5 + $0x58] sm:$0xff] (%p411_p2)  ;;  %470 = vmatpush.msra.mxu1 (%p411_p2), %v469_v41  ;;  %v467_v44 = vld [vmem:[%s1249_s6 + $0x68] sm:$0xff] (%p411_p2)  ;;  %v427_v45 = vld [vmem:[%s1242_s5 + $0x50] sm:$0xff] (%p411_p2) }
 0x268   : > { %434 = vmatpush.msra.mxu0 (%p411_p2), %v431_v38  ;;  %v466_v46 = vld [vmem:[%s1249_s6 + $0x60] sm:$0xff] (%p411_p2)  ;;  %v426_v47 = vld [vmem:[%s1242_s5 + $0x48] sm:$0xff] (%p411_p2)  ;;  %v465_v48 = vld [vmem:[%s1249_s6 + $0x58] sm:$0xff] (%p411_p2) }
 0x269   : > { %471 = vmatpush.msra.mxu1 (%p411_p2), %v468_v43  ;;  %v425_v49 = vld [vmem:[%s1242_s5 + $0x40] sm:$0xff] (%p411_p2)  ;;  %v464_v50 = vld [vmem:[%s1249_s6 + $0x50] sm:$0xff] (%p411_p2)  ;;  %v424_v51 = vld [vmem:[%s1242_s5 + $0x38] sm:$0xff] (%p411_p2) }
 0x26a   : > { %435 = vmatpush.msra.mxu0 (%p411_p2), %v430_v39  ;;  %v463_v52 = vld [vmem:[%s1249_s6 + $0x48] sm:$0xff] (%p411_p2)  ;;  %v423_v53 = vld [vmem:[%s1242_s5 + $0x30] sm:$0xff] (%p411_p2)  ;;  %v462_v54 = vld [vmem:[%s1249_s6 + $0x40] sm:$0xff] (%p411_p2) }
 0x26b   : > { %472 = vmatpush.msra.mxu1 %v467_v44  ;;  %v422_v55 = vld [vmem:[%s1242_s5 + $0x28] sm:$0xff]  ;;  %v461_v56 = vld [vmem:[%s1249_s6 + $0x38] sm:$0xff]  ;;  %v421_v57 = vld [vmem:[%s1242_s5 + $0x20] sm:$0xff] }
 0x26c   : > { %436 = vmatpush.msra.mxu0 %v429_v40  ;;  %v460_v58 = vld [vmem:[%s1249_s6 + $0x30] sm:$0xff]  ;;  %v420_v59 = vld [vmem:[%s1242_s5 + $0x18] sm:$0xff]  ;;  %v459_v60 = vld [vmem:[%s1249_s6 + $0x28] sm:$0xff] }
 0x26d   : > { %473 = vmatpush.msra.mxu1 %v466_v46  ;;  %v419_v61 = vld [vmem:[%s1242_s5 + $0x10] sm:$0xff]  ;;  %v458_v62 = vld [vmem:[%s1249_s6 + $0x20] sm:$0xff]  ;;  %v418_v63 = vld [vmem:[%s1242_s5 + $0x8] sm:$0xff] }
 0x26e   : > { %437 = vmatpush.msra.mxu0 %v428_v42  ;;  %v457_v0 = vld [vmem:[%s1249_s6 + $0x18] sm:$0xff]  ;;  %v417_v1 = vld [vmem:[%s1242_s5] sm:$0xff]  ;;  %v416_v2 = vld [vmem:[#allocation5] sm:$0xff] }
 0x26f   : > { %474 = vmatpush.msra.mxu1 %v465_v48  ;;  %v456_v3 = vld [vmem:[%s1249_s6 + $0x10] sm:$0xff]  ;;  %v455_v4 = vld [vmem:[%s1249_s6 + $0x8] sm:$0xff]  ;;  %v454_v5 = vld [vmem:[%s1249_s6] sm:$0xff] }
 0x270   : > { %438 = vmatpush.msra.mxu0 %v427_v45 }
 0x271   : > { %475 = vmatpush.msra.mxu1 %v464_v50 }
 0x272   : > { %439 = vmatpush.msra.mxu0 %v426_v47 }
 0x273   : > { %476 = vmatpush.msra.mxu1 %v463_v52 }
 0x274   : > { %440 = vmatpush.msra.mxu0 %v425_v49 }
 0x275   : > { %477 = vmatpush.msra.mxu1 %v462_v54 }
 0x276   : > { %441 = vmatpush.msra.mxu0 %v424_v51 }
 0x277   : > { %478 = vmatpush.msra.mxu1 %v461_v56 }
 0x278   : > { %442 = vmatpush.msra.mxu0 %v423_v53 }
 0x279   : > { %479 = vmatpush.msra.mxu1 %v460_v58 }
 0x27a   : > { %443 = vmatpush.msra.mxu0 %v422_v55 }
 0x27b   : > { %480 = vmatpush.msra.mxu1 %v459_v60 }
 0x27c   : > { %444 = vmatpush.msra.mxu0 %v421_v57 }
 0x27d   : > { %481 = vmatpush.msra.mxu1 %v458_v62 }
 0x27e   : > { %445 = vmatpush.msra.mxu0 %v420_v59 }
 0x27f   : > { %482 = vmatpush.msra.mxu1 %v457_v0 }
 0x280   : > { %446 = vmatpush.msra.mxu0 %v419_v61 }
 0x281   : > { %483 = vmatpush.msra.mxu1 %v456_v3 }
 0x282   : > { %447 = vmatpush.msra.mxu0 %v418_v63 }
 0x283   : > { %484 = vmatpush.msra.mxu1 %v455_v4 }
 0x284   : > { %448 = vmatpush.msra.mxu0 %v417_v1 }
 0x285   : > { %449 = vmatmul.f32.vlgmr.msra.gmra.mxu0 %v416_v2  ;;  %485 = vmatpush.msra.mxu1 %v454_v5 }
 0x302   : > { %v450_v6 = vpop.f32.mrf.mxu0 }
 0x303   : > { %453 = vst [vmem:[#allocation2] sm:$0xff] %v450_v6  ;;  %486 = vmatmul.f32.vlgmr.msra.gmra.mxu1 %v450_v6 }
 0x380   : > { %v487_v7 = vpop.f32.mrf.mxu1 }
 0x381   : > { %491 = vst.msk [vmem:[#allocation3] sm:$0xff] %vm490_vm2, %v487_v7  ;;  %493 = vrot.lane.b32.xlu0 %v487_v7, %s1101_s7 }
 0x3f3   : > { %v494_v8 = vpop.permute.xlu0 %493 }
 0x3f4   : > { %496 = vxpose.xlu0.b32.start.end [1/1] (short) (narrow) %v494_v8, 8 }
 0x498   : > { %v512_v9 = vpop.trf.xlu0 }
 0x499   : > { %529 = vst.msk [vmem:[#allocation4] sm:$0x1] %vm528_vm3, %v512_v9 }
 0x49a PF: > { %v532_v10 = vld [vmem:[#allocation3] sm:$0xff]  ;;  %v1102_v11 = vmov 0   ;;  %v582_v12 = vld [vmem:[#allocation2] sm:$0xff]  ;;  %vm550_vm4 = vcmask 64512   ;;  %p767_p3 = scmp.ne.s32.totalorder %s1086_s18, 0 }
 0x49b   : > { %872 = vset.pattern.permute.xlu0 %v1102_v11  ;;  %601 = vmatpush.msra.mxu0 %v582_v12  ;;  %v547_v19 = vld [vmem:[#allocation9] sm:$0xff] }
 0x49c   : > { %536 = vperm.xlu0 %872, %v532_v10  }
 0x4a0   : > { %v873_v13 = vld [vmem:[#allocation4] ss:$0 sm:$0xff] }
 0x50e   : > { %v537_v14 = vpop.permute.xlu0 %536 }
 0x50f   : > { %v542_v15 = vadd.f32 %v873_v13, %v537_v14 }
 0x511   : > { %v543_v16 = vmul.f32 0.5, %v542_v15 }
 0x513   : > { %874 = vtanh.f32 %v543_v16 }
 0x519   : > { %v875_v17 = vpop.eup %874 }
 0x51a   : > { %v545_v18 = vadd.f32 1.0, %v875_v17 }
 0x51c   : > { %v546_v20 = vmul.f32 0.5, %v545_v18 }
 0x51e   : > { %v548_v21 = vmul.f32 %v547_v19, %v546_v20 }
 0x520   : > { %766 = vmatmul.msk.f32.vlgmr.msra.gmra.mxu0 %vm550_vm4, %v548_v21  ;;  %v549_v22 = vmul.f32 %v548_v21, %v548_v21 }
 0x522   : > { %v551_v23 = vsel %vm550_vm4, %v549_v22, 0.0 }
 0x523   : > { %552 = vadd.xlane.f32.xlu0 %v551_v23 }
 0x596   : > { %v553_v24 = vpop.xlane.xlu0 %552 }
 0x597   : > { %876 = vrsqrt.f32 %v553_v24  ;;  %vm561_vm5 = vcmp.eq.f32.partialorder %v553_v24, inf  ;;  %v564_v32 = vand.u32 2147483648, %v553_v24  ;;  %vm563_vm6 = vcmp.eq.f32.partialorder %v553_v24, 0.0 }
 0x59d   : > { %v877_v25 = vpop.eup %876  ;;  %v603_v46 = vpop.f32.mrf.mxu0 }
 0x59e   : > { %v555_v26 = vmul.f32 %v877_v25, %v553_v24 }
 0x5a0   : > { %v556_v27 = vmul.f32 %v877_v25, %v555_v26 }
 0x5a2   : > { %v557_v28 = vmul.f32 0.5, %v556_v27 }
 0x5a4   : > { %v558_v29 = vsub.f32 1.5, %v557_v28 }
 0x5a6   : > { %v559_v30 = vmul.f32 %v877_v25, %v558_v29 }
 0x5a8   : > { %v560_v31 = vmul.f32 %v559_v30, %v553_v24 }
 0x5aa   : > { %v562_v33 = vsel %vm561_vm5, %v553_v24, %v560_v31 }
 0x5ab   : > { %v565_v34 = vsel %vm563_vm6, %v564_v32, %v562_v33 }
 0x5ac   : > { %v566_v35 = vadd.f32 1e-10, %v565_v34 }
 0x5ae   : > { %878 = vrcp.f32 %v566_v35  ;;  %v578_v39 = vand.u32 2147483648, %v566_v35  ;;  %v576_v41 = vand.u32 2147483647, %v566_v35  ;;  %vm572_vm8 = vweird.f32 %v566_v35 }
 0x5b0   : > { %v579_v43 = vor.u32 1.1754944e-38, %v578_v39  ;;  %vm577_vm10 = vcmp.eq.f32.partialorder %v576_v41, 8.507059e+37 }
 0x5b4   : > { %v879_v36 = vpop.eup %878 }
 0x5b5   : > { %v568_v37 = vmul.f32 %v879_v36, %v566_v35  ;;  %vm573_vm7 = vweird.f32 %v879_v36 }
 0x5b6   : > { %vm574_vm9 = vmor %vm572_vm8, %vm573_vm7 }
 0x5b7   : > { %v569_v38 = vsub.f32 1.0, %v568_v37 }
 0x5b9   : > { %v570_v40 = vmul.f32 %v879_v36, %v569_v38 }
 0x5bb   : > { %v571_v42 = vadd.f32 %v879_v36, %v570_v40  ;;  %609 = sbr.rel (%p767_p3) target bundleno = 1474 (0x5c2), region = 64 }
 0x5bd   : > { %v575_v44 = vsel %vm574_vm9, %v879_v36, %v571_v42 }
 0x5be   : > { %v580_v45 = vsel %vm577_vm10, %v579_v43, %v575_v44 }
 0x5bf   : > { %v606_v47 = vmul.f32 %v603_v46, %v580_v45 }
 0x5c1   : > { %611 = vst [vmem:[#allocation5] sm:$0xff] %v606_v47 }
 0x5c2 PF: > { %p768_p4 = scmp.ne.s32.totalorder %s1086_s18, 1 }
 0x5c4   : > { %614 = sbr.rel (%p768_p4) target bundleno = 1745 (0x6d1), region = 68 }
 0x5c9   : > { %v615_v48 = vlaneseq }
 0x5cb   : > { %v616_v49 = vand.u32 127, %v615_v48 }
 0x5cd   : > { %vm617_vm11 = vcmp.lt.s32.totalorder %v616_v49, 8 }
 0x5ce   : > { %v618_v50 = vsel %vm617_vm11, %v606_v47, -inf }
 0x5cf   : > { %619 = vmax.xlane.f32.xlu0 %v618_v50 }
 0x642   : > { %v620_v51 = vpop.xlane.xlu0 %619 }
 0x643   : > { %v621_v52 = vsub.f32 %v618_v50, %v620_v51 }
 0x645   : > { %v622_v53 = vmul.f32 1.442695, %v621_v52 }
 0x647   : > { %880 = vpow2.f32 %v622_v53 }
 0x64d   : > { %v881_v54 = vpop.eup %880 }
 0x64e   : > { %624 = vadd.xlane.f32.xlu0 %v881_v54 }
 0x6c1   : > { %v625_v55 = vpop.xlane.xlu0 %624 }
 0x6c2   : > { %882 = vlog2.f32 %v625_v55 }
 0x6c8   : > { %v883_v56 = vpop.eup %882 }
 0x6c9   : > { %v627_v57 = vmul.f32 0.6931472, %v883_v56 }
 0x6cb   : > { %v628_v58 = vadd.f32 %v627_v57, %v620_v51 }
 0x6cd   : > { %v629_v59 = vsub.f32 %v606_v47, %v628_v58 }
 0x6cf   : > { %v630_v60 = vsel %vm617_vm11, %v629_v59, 0.0 }
 0x6d0   : > { %632 = vst [vmem:[#allocation13] sm:$0xff] %v630_v60 }
 0x6d1 PF: > { %p812_p5 = scmp.eq.s32.totalorder %s1158_s21, 1  ;;  %s641_s10 = sshll.u32 %s1344_s4, 4  ;;  %s642_s10 = int_to_ptr.hbm [resolvable:$true] %s641_s10 }
 0x6d2   : > { %s1103_s12 = smov [#allocation13]  }
 0x6d3   : > { %s639_s25 = sshll.u32 %s1103_s12, 4  ;;  %s640_s25 = int_to_ptr.vmem [resolvable:$true] %s639_s25 }
 0x6d4   : > { %790 = dma.vmem_to_hbm [thread:$0]  (%p812_p5), %s640_s25, 128, %s642_s10, [#allocation8]  }
 0x6d5   : > { %1069 = dma.done.wait (%p812_p5), [#allocation8], 128  }
 0x6d6   : > { %1071 = vsyncadd (%p812_p5), [#allocation8], 4294967168 }
 0x6d7 PF: > { %s17_s20 = sadd.s32 1, %s1094_s20   ;;  %s1358_s18 = sld [smem:[#allocation18_spill]] }
 0x6d8   : > { %p14_p6 = scmp.ge.s32.totalorder %s17_s20, 4   ;;  %s1359_s19 = sld [smem:[#allocation19_spill]] }
 0x6d9   : > { %s1360_s15 = smov %s1078_s16  ;;  %s1361_s16 = smov %s1082_s17 }
 0x6da   : > { %s1362_s17 = smov %s1216_s26  ;;  %16 = sbr.rel (!%p14_p6) target bundleno = 8 (0x8), region = 111 }
 0x6df   :  { %655 = vsyncpa [#allocation7], 1 }
 0x6e0   :  { %657 = vsyncpa [#allocation7 + $0x1], 1 }
 0x6e1   :  { %658 = vsyncpa [#allocation10], 1 }
 0x6e2   :  { %659 = vsyncpa [#allocation8], 1 }
 0x6e3   :  { %661 = vsyncpa [#allocation8 + $0x1], 1 }

</bundles_post_ra>
